<compile_context>
chip_gen: v6e
topology: v6e:2x2x1
jax: 0.10.0
libtpu: 0.0.40
codegen_flags: <defaults>
</compile_context>

<pallas_src>
import functools

import jax
import jax.numpy as jnp
from jax.experimental import pallas as pl
from jax.experimental.pallas import tpu as pltpu


def _round_up(n, m):
    return ((n + m - 1) // m) * m


def _mlp_kernel(x_ref, w1_ref, b1_ref, w2_ref, b2_ref, w3_ref, b3_ref, o_ref,
                *, nb, d_in, compute_dtype):
    # x_ref: (ts, nb*d_in) in the input dtype (f32) -- cast to the MXU dtype in-register.
    # Weights are bf16 (padded); biases are f32 and add onto the f32 accumulator.
    w1 = w1_ref[...]
    w2 = w2_ref[...]
    w3 = w3_ref[...]
    b1 = b1_ref[...]
    b2 = b2_ref[...]
    b3 = b3_ref[...]
    for b in range(nb):                                   # static unroll over folded batch cols
        x = x_ref[:, b * d_in:(b + 1) * d_in].astype(compute_dtype)   # (ts, d_in) VPU cast
        h1 = jnp.dot(x, w1, preferred_element_type=jnp.float32) + b1
        h1 = jnp.maximum(h1, 0.0).astype(compute_dtype)               # ReLU -> bf16
        h2 = jnp.dot(h1, w2, preferred_element_type=jnp.float32) + b2
        h2 = jnp.maximum(h2, 0.0).astype(compute_dtype)               # ReLU -> bf16
        y = jnp.dot(h2, w3, preferred_element_type=jnp.float32) + b3  # (ts, D_out)
        o_ref[b] = y.astype(o_ref.dtype)                              # direct un-padded store


def prepare_disambiguator_params(params, compute_dtype=jnp.bfloat16):
    """One-time pad/cast of the weights (hoisted out of the per-call forward).

    H1/H2 are zero-padded to multiples of 128 (exact: ReLU(0)=0, zero rows of W
    contribute nothing); weights are cast to the MXU dtype; biases stay f32.
    """
    w1, b1, w2, b2, w3, b3 = params
    d_in, h1 = w1.shape
    h2 = w2.shape[1]
    d_out = w3.shape[1]
    h1p = _round_up(h1, 128)
    h2p = _round_up(h2, 128)

    w1p = jnp.zeros((d_in, h1p), compute_dtype).at[:, :h1].set(w1.astype(compute_dtype))
    b1p = jnp.zeros((1, h1p), jnp.float32).at[0, :h1].set(b1.astype(jnp.float32))
    w2p = jnp.zeros((h1p, h2p), compute_dtype).at[:h1, :h2].set(w2.astype(compute_dtype))
    b2p = jnp.zeros((1, h2p), jnp.float32).at[0, :h2].set(b2.astype(jnp.float32))
    w3p = jnp.zeros((h2p, d_out), compute_dtype).at[:h2, :].set(w3.astype(compute_dtype))
    b3p = b3.reshape(1, d_out).astype(jnp.float32)
    return (w1p, b1p, w2p, b2p, w3p, b3p)


@functools.partial(jax.jit, static_argnames=("tile_s",))
def disambiguator_forward(x, prepared, *, tile_s=512):
    """x: (S, B, D_in), prepared = prepare_disambiguator_params(...)  ->  (B, S, D_out)."""
    w1p, b1p, w2p, b2p, w3p, b3p = prepared
    S, B, D_in = x.shape
    assert D_in == w1p.shape[0]
    H1p = w1p.shape[1]
    H2p = w2p.shape[1]
    D_out = w3p.shape[1]
    compute_dtype = w1p.dtype

    # The x block slices batch columns out of the (S, B*D_in) slab at lane granularity.
    # TODO(synk): pad D_in for inputs that are not a multiple of 128.
    assert D_in % 128 == 0, "input_dim must be a multiple of 128 for this kernel"

    x_item = jnp.dtype(x.dtype).itemsize
    w_item = jnp.dtype(compute_dtype).itemsize

    # S-tile: multiple of 16 (bf16 sublane packing) once S is big enough, else multiple of 8.
    ts = min(tile_s, _round_up(S, 16)) if S >= 16 else _round_up(S, 8)

    # VMEM budget: weights (double-buffered) + per-batch-column x/out tiles (double-buffered)
    # + f32 intermediates.  Keeps the footprint comfortably under the 32 MiB scoped limit.
    budget = 24 * 1024 * 1024
    w_bytes = 2 * w_item * (D_in * H1p + H1p * H2p + H2p * D_out)

    def _footprint(ts_, nb_):
        io = 2 * ts_ * (D_in + D_out) * x_item          # x + out tiles, double-buffered
        mid = 4 * ts_ * (H1p + H2p)                     # f32 intermediates
        return w_bytes + nb_ * (io + mid)

    while _footprint(ts, 1) > budget and ts > 16:       # huge D_in: shrink the S tile first
        ts = max(16, ((ts // 2) + 7) // 8 * 8)
    per_col = _footprint(ts, 1) - w_bytes
    nb = max(1, min(B, (budget - w_bytes) // max(per_col, 1)))

    n_s = pl.cdiv(S, ts)
    n_b = pl.cdiv(B, nb)
    # v7x has 2 TensorCores sharded over parallel grid axes: avoid a 1-step grid when S allows.
    if n_s * n_b < 2 and S > 16:
        ts = min(ts, _round_up(pl.cdiv(S, 2), 16))
        n_s = pl.cdiv(S, ts)
    grid = (n_s, n_b)

    # Row-major merge (free, no copy); dtype unchanged -- the bf16 cast happens in-kernel.
    x2d = x.reshape(S, B * D_in)

    out = pl.pallas_call(
        functools.partial(_mlp_kernel, nb=nb, d_in=D_in, compute_dtype=compute_dtype),
        out_shape=jax.ShapeDtypeStruct((B, S, D_out), x.dtype),   # permuted layout, un-padded
        grid_spec=pltpu.PrefetchScalarGridSpec(
            num_scalar_prefetch=0,
            grid=grid,
            in_specs=[
                pl.BlockSpec((ts, nb * D_in), lambda i, j: (i, j)),   # contiguous x slab
                pl.BlockSpec((D_in, H1p), lambda i, j: (0, 0)),       # W1 (padded, resident)
                pl.BlockSpec((1, H1p), lambda i, j: (0, 0)),          # b1
                pl.BlockSpec((H1p, H2p), lambda i, j: (0, 0)),        # W2 (padded, resident)
                pl.BlockSpec((1, H2p), lambda i, j: (0, 0)),          # b2
                pl.BlockSpec((H2p, D_out), lambda i, j: (0, 0)),      # W3 (rows padded, resident)
                pl.BlockSpec((1, D_out), lambda i, j: (0, 0)),        # b3
            ],
            out_specs=pl.BlockSpec((nb, ts, D_out), lambda i, j: (j, i, 0)),
        ),
        compiler_params=pltpu.CompilerParams(
            dimension_semantics=("parallel", "parallel"),
            vmem_limit_bytes=32 * 1024 * 1024,
        ),
    )(x2d, w1p, b1p, w2p, b2p, w3p, b3p)

    return out                                            # already (B, S, D_out), no slice pass


def init_disambiguator_params(key, input_dim, output_dim=200, dtype=jnp.float32):
    """Deterministic synthetic init with the same shapes as the PyTorch module."""
    layer_mult = (input_dim / output_dim) ** (1.0 / 3.0)
    hidden_dim_1 = round(output_dim * layer_mult)
    hidden_dim_2 = round(output_dim * layer_mult ** 2)

    dims = [(input_dim, hidden_dim_1), (hidden_dim_1, hidden_dim_2), (hidden_dim_2, output_dim)]
    params = []
    for fan_in, fan_out in dims:
        kw, kb, key = jax.random.split(key, 3)
        bound = 1.0 / (fan_in ** 0.5)  # matches nn.Linear's uniform bound
        w = jax.random.uniform(kw, (fan_in, fan_out), dtype, minval=-bound, maxval=bound)
        b = jax.random.uniform(kb, (fan_out,), dtype, minval=-bound, maxval=bound)
        params += [w, b]
    return tuple(params)


def _reference_forward(x, params):
    w1, b1, w2, b2, w3, b3 = params
    h1 = jnp.maximum(x @ w1 + b1, 0.0)
    h2 = jnp.maximum(h1 @ w2 + b2, 0.0)
    y = h2 @ w3 + b3
    return jnp.transpose(y, (1, 0, 2))


if __name__ == "__main__":
    # Small shapes: input_dim=256, output_dim=32 -> layer_mult=2, hidden dims (64, 128).
    S, B, D_IN, D_OUT = 8, 2, 256, 32

    key = jax.random.PRNGKey(0)
    kx, kp = jax.random.split(key)
    x = jax.random.normal(kx, (S, B, D_IN), jnp.float32)
    params = init_disambiguator_params(kp, D_IN, D_OUT)
    prepared = prepare_disambiguator_params(params)       # one-time pad/cast (cache & reuse)

    out = disambiguator_forward(x, prepared)
    out = jax.block_until_ready(out)

    ref = _reference_forward(x, params)
    assert out.shape == (B, S, D_OUT), out.shape
    # bf16 MXU operands with f32 accumulation vs. the pure-f32 reference.
    assert jnp.allclose(out, ref, atol=2e-2, rtol=2e-2), float(jnp.max(jnp.abs(out - ref)))

    print("KERNEL_OK")
</pallas_src>

<mosaic_0001>
module attributes {stable_mosaic.version = 11 : i64} {
  func.func @_mlp_kernel(%arg0: i32, %arg1: i32, %arg2: memref<8x512xf32, #tpu.memory_space<vmem>>, %arg3: memref<256x128xbf16, #tpu.memory_space<vmem>>, %arg4: memref<1x128xf32, #tpu.memory_space<vmem>>, %arg5: memref<128x128xbf16, #tpu.memory_space<vmem>>, %arg6: memref<1x128xf32, #tpu.memory_space<vmem>>, %arg7: memref<128x32xbf16, #tpu.memory_space<vmem>>, %arg8: memref<1x32xf32, #tpu.memory_space<vmem>>, %arg9: memref<2x8x32xf32, #tpu.memory_space<vmem>>) attributes {dimension_semantics = [#tpu.dimension_semantics<parallel>, #tpu.dimension_semantics<parallel>], iteration_bounds = array<i64: 1, 1>, scalar_prefetch = 0 : i64, scratch_operands = 0 : i64, tpu.core_type = #tpu.core_type<tc>, window_params = [{transform_indices = @transform_0, window_bounds = array<i64: 8, 512>}, {pipeline_mode = #tpu.pipeline_mode<synchronous>, transform_indices = @transform_1, window_bounds = array<i64: 256, 128>}, {pipeline_mode = #tpu.pipeline_mode<synchronous>, transform_indices = @transform_2, window_bounds = array<i64: 1, 128>}, {pipeline_mode = #tpu.pipeline_mode<synchronous>, transform_indices = @transform_3, window_bounds = array<i64: 128, 128>}, {pipeline_mode = #tpu.pipeline_mode<synchronous>, transform_indices = @transform_4, window_bounds = array<i64: 1, 128>}, {pipeline_mode = #tpu.pipeline_mode<synchronous>, transform_indices = @transform_5, window_bounds = array<i64: 128, 32>}, {pipeline_mode = #tpu.pipeline_mode<synchronous>, transform_indices = @transform_6, window_bounds = array<i64: 1, 32>}, {transform_indices = @transform_7, window_bounds = array<i64: 2, 8, 32>}]} {
    %c0 = arith.constant 0 : index
    %c0_0 = arith.constant 0 : index
    %0 = vector.load %arg3[%c0, %c0_0] : memref<256x128xbf16, #tpu.memory_space<vmem>>, vector<256x128xbf16>
    %c0_1 = arith.constant 0 : index
    %c0_2 = arith.constant 0 : index
    %1 = vector.load %arg5[%c0_1, %c0_2] : memref<128x128xbf16, #tpu.memory_space<vmem>>, vector<128x128xbf16>
    %c0_3 = arith.constant 0 : index
    %c0_4 = arith.constant 0 : index
    %2 = vector.load %arg7[%c0_3, %c0_4] : memref<128x32xbf16, #tpu.memory_space<vmem>>, vector<128x32xbf16>
    %c0_5 = arith.constant 0 : index
    %c0_6 = arith.constant 0 : index
    %3 = vector.load %arg4[%c0_5, %c0_6] : memref<1x128xf32, #tpu.memory_space<vmem>>, vector<1x128xf32>
    %c0_7 = arith.constant 0 : index
    %c0_8 = arith.constant 0 : index
    %4 = vector.load %arg6[%c0_7, %c0_8] : memref<1x128xf32, #tpu.memory_space<vmem>>, vector<1x128xf32>
    %c0_9 = arith.constant 0 : index
    %c0_10 = arith.constant 0 : index
    %5 = vector.load %arg8[%c0_9, %c0_10] : memref<1x32xf32, #tpu.memory_space<vmem>>, vector<1x32xf32>
    %c0_11 = arith.constant 0 : index
    %c0_12 = arith.constant 0 : index
    %6 = vector.load %arg2[%c0_11, %c0_12] : memref<8x512xf32, #tpu.memory_space<vmem>>, vector<8x256xf32>
    %7 = arith.truncf %6 : vector<8x256xf32> to vector<8x256xbf16>
    %cst = arith.constant dense<0.000000e+00> : vector<8x128xf32>
    %8 = tpu.matmul %7, %0, %cst {dimension_numbers = #tpu.dot_dimension_numbers<[1], [0], [0], [1], [0, 0, 1, 1], [], []>} : vector<8x256xbf16>, vector<256x128xbf16>, vector<8x128xf32> -> vector<8x128xf32>
    %9 = vector.broadcast %3 : vector<1x128xf32> to vector<8x128xf32>
    %10 = arith.addf %8, %9 : vector<8x128xf32>
    %cst_13 = arith.constant 0.000000e+00 : f32
    %11 = vector.broadcast %cst_13 : f32 to vector<8x128xf32>
    %12 = arith.maximumf %10, %11 : vector<8x128xf32>
    %13 = arith.truncf %12 : vector<8x128xf32> to vector<8x128xbf16>
    %cst_14 = arith.constant dense<0.000000e+00> : vector<8x128xf32>
    %14 = tpu.matmul %13, %1, %cst_14 {dimension_numbers = #tpu.dot_dimension_numbers<[1], [0], [0], [1], [0, 0, 1, 1], [], []>} : vector<8x128xbf16>, vector<128x128xbf16>, vector<8x128xf32> -> vector<8x128xf32>
    %15 = vector.broadcast %4 : vector<1x128xf32> to vector<8x128xf32>
    %16 = arith.addf %14, %15 : vector<8x128xf32>
    %cst_15 = arith.constant 0.000000e+00 : f32
    %17 = vector.broadcast %cst_15 : f32 to vector<8x128xf32>
    %18 = arith.maximumf %16, %17 : vector<8x128xf32>
    %19 = arith.truncf %18 : vector<8x128xf32> to vector<8x128xbf16>
    %cst_16 = arith.constant dense<0.000000e+00> : vector<8x32xf32>
    %20 = tpu.matmul %19, %2, %cst_16 {dimension_numbers = #tpu.dot_dimension_numbers<[1], [0], [0], [1], [0, 0, 1, 1], [], []>} : vector<8x128xbf16>, vector<128x32xbf16>, vector<8x32xf32> -> vector<8x32xf32>
    %21 = vector.broadcast %5 : vector<1x32xf32> to vector<8x32xf32>
    %22 = arith.addf %20, %21 : vector<8x32xf32>
    %c0_17 = arith.constant 0 : index
    %c0_18 = arith.constant 0 : index
    %c0_19 = arith.constant 0 : index
    %23 = vector.load %arg9[%c0_17, %c0_18, %c0_19] : memref<2x8x32xf32, #tpu.memory_space<vmem>>, vector<1x8x32xf32>
    %24 = vector.shape_cast %23 : vector<1x8x32xf32> to vector<8x32xf32>
    %25 = vector.shape_cast %22 : vector<8x32xf32> to vector<1x8x32xf32>
    tpu.vector_store %arg9[%c0_17, %c0_18, %c0_19], %25 {strides = array<i32>} : memref<2x8x32xf32, #tpu.memory_space<vmem>>, vector<1x8x32xf32>,
    %c0_20 = arith.constant 0 : index
    %c256 = arith.constant 256 : index
    %26 = vector.load %arg2[%c0_20, %c256] : memref<8x512xf32, #tpu.memory_space<vmem>>, vector<8x256xf32>
    %27 = arith.truncf %26 : vector<8x256xf32> to vector<8x256xbf16>
    %cst_21 = arith.constant dense<0.000000e+00> : vector<8x128xf32>
    %28 = tpu.matmul %27, %0, %cst_21 {dimension_numbers = #tpu.dot_dimension_numbers<[1], [0], [0], [1], [0, 0, 1, 1], [], []>} : vector<8x256xbf16>, vector<256x128xbf16>, vector<8x128xf32> -> vector<8x128xf32>
    %29 = vector.broadcast %3 : vector<1x128xf32> to vector<8x128xf32>
    %30 = arith.addf %28, %29 : vector<8x128xf32>
    %cst_22 = arith.constant 0.000000e+00 : f32
    %31 = vector.broadcast %cst_22 : f32 to vector<8x128xf32>
    %32 = arith.maximumf %30, %31 : vector<8x128xf32>
    %33 = arith.truncf %32 : vector<8x128xf32> to vector<8x128xbf16>
    %cst_23 = arith.constant dense<0.000000e+00> : vector<8x128xf32>
    %34 = tpu.matmul %33, %1, %cst_23 {dimension_numbers = #tpu.dot_dimension_numbers<[1], [0], [0], [1], [0, 0, 1, 1], [], []>} : vector<8x128xbf16>, vector<128x128xbf16>, vector<8x128xf32> -> vector<8x128xf32>
    %35 = vector.broadcast %4 : vector<1x128xf32> to vector<8x128xf32>
    %36 = arith.addf %34, %35 : vector<8x128xf32>
    %cst_24 = arith.constant 0.000000e+00 : f32
    %37 = vector.broadcast %cst_24 : f32 to vector<8x128xf32>
    %38 = arith.maximumf %36, %37 : vector<8x128xf32>
    %39 = arith.truncf %38 : vector<8x128xf32> to vector<8x128xbf16>
    %cst_25 = arith.constant dense<0.000000e+00> : vector<8x32xf32>
    %40 = tpu.matmul %39, %2, %cst_25 {dimension_numbers = #tpu.dot_dimension_numbers<[1], [0], [0], [1], [0, 0, 1, 1], [], []>} : vector<8x128xbf16>, vector<128x32xbf16>, vector<8x32xf32> -> vector<8x32xf32>
    %41 = vector.broadcast %5 : vector<1x32xf32> to vector<8x32xf32>
    %42 = arith.addf %40, %41 : vector<8x32xf32>
    %c1 = arith.constant 1 : index
    %c0_26 = arith.constant 0 : index
    %c0_27 = arith.constant 0 : index
    %43 = vector.load %arg9[%c1, %c0_26, %c0_27] : memref<2x8x32xf32, #tpu.memory_space<vmem>>, vector<1x8x32xf32>
    %44 = vector.shape_cast %43 : vector<1x8x32xf32> to vector<8x32xf32>
    %45 = vector.shape_cast %42 : vector<8x32xf32> to vector<1x8x32xf32>
    tpu.vector_store %arg9[%c1, %c0_26, %c0_27], %45 {strides = array<i32>} : memref<2x8x32xf32, #tpu.memory_space<vmem>>, vector<1x8x32xf32>,
    return
  }
  func.func @transform_0(%arg0: i32, %arg1: i32) -> (i32, i32) {
    %c0_i32 = arith.constant 0 : i32
    return %arg0, %arg1 : i32, i32
  }
  func.func @transform_1(%arg0: i32, %arg1: i32) -> (i32, i32) {
    %c0_i32 = arith.constant 0 : i32
    %c0_i32_0 = arith.constant 0 : i32
    %c0_i32_1 = arith.constant 0 : i32
    return %c0_i32, %c0_i32_0 : i32, i32
  }
  func.func @transform_2(%arg0: i32, %arg1: i32) -> (i32, i32) {
    %c0_i32 = arith.constant 0 : i32
    %c0_i32_0 = arith.constant 0 : i32
    %c0_i32_1 = arith.constant 0 : i32
    return %c0_i32, %c0_i32_0 : i32, i32
  }
  func.func @transform_3(%arg0: i32, %arg1: i32) -> (i32, i32) {
    %c0_i32 = arith.constant 0 : i32
    %c0_i32_0 = arith.constant 0 : i32
    %c0_i32_1 = arith.constant 0 : i32
    return %c0_i32, %c0_i32_0 : i32, i32
  }
  func.func @transform_4(%arg0: i32, %arg1: i32) -> (i32, i32) {
    %c0_i32 = arith.constant 0 : i32
    %c0_i32_0 = arith.constant 0 : i32
    %c0_i32_1 = arith.constant 0 : i32
    return %c0_i32, %c0_i32_0 : i32, i32
  }
  func.func @transform_5(%arg0: i32, %arg1: i32) -> (i32, i32) {
    %c0_i32 = arith.constant 0 : i32
    %c0_i32_0 = arith.constant 0 : i32
    %c0_i32_1 = arith.constant 0 : i32
    return %c0_i32, %c0_i32_0 : i32, i32
  }
  func.func @transform_6(%arg0: i32, %arg1: i32) -> (i32, i32) {
    %c0_i32 = arith.constant 0 : i32
    %c0_i32_0 = arith.constant 0 : i32
    %c0_i32_1 = arith.constant 0 : i32
    return %c0_i32, %c0_i32_0 : i32, i32
  }
  func.func @transform_7(%arg0: i32, %arg1: i32) -> (i32, i32, i32) {
    %c0_i32 = arith.constant 0 : i32
    %c0_i32_0 = arith.constant 0 : i32
    return %arg1, %arg0, %c0_i32 : i32, i32, i32
  }
}

</mosaic_0001>

<bundles_post_ra>
// kernel: disambiguator_forward.1
= control target key start
LH: loop header
LB: loop body
LE: loop exit
PB: predicated region body
PF: predicated region fallthrough
CT: control target
= control target key end

     0   :  { %12 = vsyncpa [#allocation3], 0  ;;  %s1160_s0 = inlined_call_operand.vmem [shape: f32[8,512], index: 0, kind: input, shape index: {}]   ;;  %s1161_s1 = inlined_call_operand.vmem [shape: bf16[256,128], index: 1, kind: input, shape index: {}]   ;;  %s1162_s2 = inlined_call_operand.vmem [shape: f32[1,128], index: 2, kind: input, shape index: {}]   ;;  %s1163_s3 = inlined_call_operand.hbm [shape: bf16[128,128], index: 3, kind: input, shape index: {}]   ;;  %s1164_s4 = inlined_call_operand.vmem [shape: f32[1,128], index: 4, kind: input, shape index: {}]   ;;  %s1165_s5 = inlined_call_operand.vmem [shape: bf16[128,32], index: 5, kind: input, shape index: {}]   ;;  %s1166_s6 = inlined_call_operand.vmem [shape: f32[1,32], index: 6, kind: input, shape index: {}]   ;;  %s1167_s7 = inlined_call_operand.hbm [shape: f32[2,8,32], index: 7, kind: output, shape index: {}]  }
   0x1   :  { %13 = vsyncpa [#allocation4], 0  ;;  %s875_s24 = smov [#allocation2]  }
   0x2   :  { %s25_s25 = sshll.u32 %s875_s24, 4  ;;  %s26_s25 = int_to_ptr.vmem [resolvable:$true] %s25_s25 }
   0x3   :  { %s839_s26 = scalar_lea.vmem %s26_s25, 1024  ;;  %p844_p1 = scmp.lt.s32.totalorder %s26_s25, %s26_s25 }
   0x4   :  { %p840_p0 = scmp.ne.s32.totalorder %s26_s25, %s839_s26  ;;  %p845_p2 = scmp.lt.s32.totalorder %s839_s26, %s839_s26 }
   0x6   :  { %p846_p3 = por %p845_p2, %p844_p1 }
   0x8   :  { %p847_p4 = pnand %p846_p3, %p840_p0 }
   0xa   :  { %850 = shalt.err (!%p847_p4)
}
   0xb   :  { %s876_s27 = smov 64   ;;  %s877_s28 = smov 4  }
   0xc   :  { %31 = dma.hbm_to_vmem [thread:$0]  %s1163_s3, 1024, %s26_s25, [#allocation3], %s876_s27, %s876_s27, %s877_s28  }
   0xd   :  { %871 = dma.done.wait [#allocation3], 1024  }
   0xe   :  { %872 = vsyncadd [#allocation3], 4294966272  ;;  %v878_v0 = vmov 0.0   ;;  %v799_v1 = vld [vmem:[%s1161_s1 + $0x78] sm:$0xff]   ;;  %v938_v3 = vld [vmem:[%s1161_s1 + $0x70] sm:$0xff]   ;;  %vm879_vm0 = vmmov 0  }
   0xf   :  { %711 = vmatprep.subr.bf16.mxu1 %v878_v0  ;;  %v933_v2 = vld [vmem:[%s1161_s1 + $0x38] sm:$0xff]   ;;  %631 = vmatprep.subr.bf16.mxu0 %v799_v1  ;;  %v944_v4 = vld [vmem:[%s1161_s1 + $0x30] sm:$0xff]   ;;  %v950_v5 = vld [vmem:[%s1161_s1 + $0x68] sm:$0xff]   ;;  %vm447_vm1 = vcmask 261120   ;;  %s880_s16 = smov [#allocation5]  }
  0x10   :  { %632 = vmatpush3.bf16.msra.mxu0 %v933_v2  ;;  %v956_v6 = vld [vmem:[%s1161_s1 + $0x28] sm:$0xff]   ;;  %v962_v7 = vld [vmem:[%s1161_s1 + $0x60] sm:$0xff]   ;;  %v974_v9 = vld [vmem:[%s1161_s1 + $0x58] sm:$0xff]   ;;  %727 = vmatprep.mubr.msk.bf16.mxu1 %vm879_vm0, %v878_v0  ;;  %s584_s17 = sshll.u32 %s880_s16, 4  ;;  %s585_s17 = int_to_ptr.vmem [resolvable:$true] %s584_s17 }
  0x11   :  { %633 = vmatprep.subr.bf16.mxu0 %v938_v3  ;;  %v968_v8 = vld [vmem:[%s1161_s1 + $0x20] sm:$0xff]   ;;  %v980_v10 = vld [vmem:[%s1161_s1 + $0x18] sm:$0xff]   ;;  %v986_v11 = vld [vmem:[%s1161_s1 + $0x50] sm:$0xff]   ;;  %p856_p6 = scmp.lt.s32.totalorder %s585_s17, %s585_s17 }
  0x12   :  { %v110_v12 = vld [vmem:[%s1160_s0 + $0x8] sm:$0xff]  ;;  %v991_v14 = vld [vmem:[#allocation2 + $0x38] sm:$0xff]   ;;  %v996_v15 = vld [vmem:[%s1161_s1 + $0x10] sm:$0xff]  }
  0x13   :  { %v112_v13 = vpack.c.bf16 %v110_v12, %v110_v12  ;;  %v1002_v16 = vld [vmem:[%s1161_s1 + $0x48] sm:$0xff]   ;;  %712 = vmatpush3.bf16.msra.mxu1 %v991_v14  ;;  %v1006_v17 = vld [vmem:[#allocation2 + $0x30] sm:$0xff]   ;;  %v1017_v19 = vld [vmem:[%s1161_s1 + $0x40] sm:$0xff]  }
  0x14   :  { %634 = vmatpush3.bf16.msra.mxu0 %v944_v4  ;;  %v1011_v18 = vld [vmem:[%s1161_s1 + $0x8] sm:$0xff]   ;;  %713 = vmatprep.subr.bf16.mxu1 %v878_v0  ;;  %v1027_v21 = vld [vmem:[%s1161_s1] sm:$0xff]   ;;  %v1041_v25 = vld [vmem:[#allocation2 + $0x18] sm:$0xff]  }
  0x15   :  { %635 = vmatprep.subr.bf16.mxu0 %v950_v5  ;;  %247 = vmatprep.mubr.bf16.mxu0 %v112_v13  ;;  %v1019_v20 = vld [vmem:[#allocation2 + $0x28] sm:$0xff]   ;;  %v109_v22 = vld [vmem:[%s1160_s0] sm:$0xff]  ;;  %v1046_v26 = vld [vmem:[#allocation2 + $0x10] sm:$0xff]  }
  0x16   :  { %v1033_v23 = vld [vmem:[#allocation2 + $0x20] sm:$0xff]   ;;  %v111_v24 = vpack.c.bf16 %v109_v22, %v109_v22  ;;  %v1051_v27 = vld [vmem:[#allocation2 + $0x8] sm:$0xff]   ;;  %v823_v29 = vld [vmem:[%s1165_s5 + $0x38] sm:$0xff]  }
  0x17   :  { %714 = vmatpush3.bf16.msra.mxu1 %v1006_v17  ;;  %v1055_v28 = vld [vmem:[#allocation2] sm:$0xff]   ;;  %v824_v30 = vld [vmem:[%s1165_s5 + $0x30] sm:$0xff]   ;;  %v825_v31 = vld [vmem:[%s1165_s5 + $0x28] sm:$0xff]  }
  0x18   :  { %636 = vmatpush3.bf16.msra.mxu0 %v956_v6  ;;  %715 = vmatprep.subr.bf16.mxu1 %v878_v0  ;;  %v826_v32 = vld [vmem:[%s1165_s5 + $0x20] sm:$0xff]   ;;  %v827_v33 = vld [vmem:[%s1165_s5 + $0x18] sm:$0xff]   ;;  %v828_v34 = vld [vmem:[%s1165_s5 + $0x10] sm:$0xff]  }
  0x19   :  { %637 = vmatprep.subr.bf16.mxu0 %v962_v7  ;;  %v1089_v36 = vld [vmem:[%s1162_s2] ss:$0 sm:$0xff]  ;;  %v450_v41 = vld [vmem:[%s1160_s0 + $0x18] sm:$0xff]  ;;  %v449_v46 = vld [vmem:[%s1160_s0 + $0x10] sm:$0xff] }
  0x1a   :  { %v452_v44 = vpack.c.bf16 %v450_v41, %v450_v41  ;;  %v451_v47 = vpack.c.bf16 %v449_v46, %v449_v46  ;;  %v829_v48 = vld [vmem:[%s1165_s5 + $0x8] sm:$0xff]   ;;  %v830_v49 = vld [vmem:[%s1165_s5] sm:$0xff]  }
  0x1b   :  { %716 = vmatpush3.bf16.msra.mxu1 %v1019_v20  ;;  %v613_v50 = vld [vmem:[%s1164_s4] ss:$0 sm:$0xff] }
  0x1c   :  { %638 = vmatpush3.bf16.msra.mxu0 %v968_v8  ;;  %717 = vmatprep.subr.bf16.mxu1 %v878_v0 }
  0x1d   :  { %639 = vmatprep.subr.bf16.mxu0 %v974_v9 }
  0x1f   :  { %718 = vmatpush3.bf16.msra.mxu1 %v1033_v23 }
  0x20   :  { %640 = vmatpush3.bf16.msra.mxu0 %v980_v10  ;;  %719 = vmatprep.subr.bf16.mxu1 %v878_v0 }
  0x21   :  { %641 = vmatprep.subr.bf16.mxu0 %v986_v11 }
  0x23   :  { %720 = vmatpush3.bf16.msra.mxu1 %v1041_v25 }
  0x24   :  { %642 = vmatpush3.bf16.msra.mxu0 %v996_v15  ;;  %721 = vmatprep.subr.bf16.mxu1 %v878_v0 }
  0x25   :  { %643 = vmatprep.subr.bf16.mxu0 %v1002_v16 }
  0x27   :  { %722 = vmatpush3.bf16.msra.mxu1 %v1046_v26 }
  0x28   :  { %644 = vmatpush3.bf16.msra.mxu0 %v1011_v18  ;;  %723 = vmatprep.subr.bf16.mxu1 %v878_v0 }
  0x29   :  { %645 = vmatprep.subr.bf16.mxu0 %v1017_v19 }
  0x2b   :  { %724 = vmatpush3.bf16.msra.mxu1 %v1051_v27 }
  0x2c   :  { %646 = vmatpush3.bf16.msra.mxu0 %v1027_v21  ;;  %725 = vmatprep.subr.bf16.mxu1 %v878_v0 }
  0x2d   :  { %731 = vmatprep.subr.bf16.mxu0 %v878_v0 }
  0x2f   :  { %248 = vmatmul.mubr.bf16.vlgmr.msra.gmra.mxu0 %v111_v24  ;;  %726 = vmatpush3.bf16.msra.mxu1 %v1055_v28 }
  0x30   :  { %671 = vmatprep.subr.bf16.mxu1 %v799_v1  ;;  %747 = vmatprep.mubr.msk.bf16.mxu0 %vm879_vm0, %v878_v0 }
  0x31   :  { %732 = vmatpush3.bf16.msra.mxu0 %v823_v29 }
  0x32   :  { %733 = vmatprep.subr.bf16.mxu0 %v878_v0 }
  0x35   :  { %734 = vmatpush3.bf16.msra.mxu0 %v824_v30 }
  0x36   :  { %735 = vmatprep.subr.bf16.mxu0 %v878_v0 }
  0x39   :  { %736 = vmatpush3.bf16.msra.mxu0 %v825_v31 }
  0x3a   :  { %737 = vmatprep.subr.bf16.mxu0 %v878_v0 }
  0x3d   :  { %738 = vmatpush3.bf16.msra.mxu0 %v826_v32 }
  0x3e   :  { %739 = vmatprep.subr.bf16.mxu0 %v878_v0 }
  0x41   :  { %740 = vmatpush3.bf16.msra.mxu0 %v827_v33 }
  0x42   :  { %741 = vmatprep.subr.bf16.mxu0 %v878_v0 }
  0x45   :  { %742 = vmatpush3.bf16.msra.mxu0 %v828_v34 }
  0x46   :  { %743 = vmatprep.subr.bf16.mxu0 %v878_v0 }
  0x49   :  { %744 = vmatpush3.bf16.msra.mxu0 %v829_v48 }
  0x4a   :  { %745 = vmatprep.subr.bf16.mxu0 %v878_v0 }
  0x4d   :  { %746 = vmatpush3.bf16.msra.mxu0 %v830_v49 }
  0x4e   :  { %751 = vmatprep.subr.bf16.mxu0 %v878_v0 }
  0xef   :  { %v647_v35 = vpop.f32.mrf.mxu0 }
  0xf1   :  { %v648_v37 = vpop.f32.mrf.mxu0 }
  0xf2   :  { %v649_v38 = vadd.f32 %v648_v37, %v647_v35 }
  0xf3   :  { %v650_v39 = vpop.f32.mrf.mxu0 }
  0xf4   :  { %v250_v40 = vadd.f32 %v649_v38, %v1089_v36 }
  0xf5   :  { %v651_v42 = vpop.f32.mrf.mxu0 }
  0xf6   :  { %v255_v43 = vmax.f32 %v250_v40, 0.0 }
  0xf8   :  { %v256_v45 = vpack.c.bf16 %v255_v43, %v255_v43 }
  0xfa   :  { %728 = vmatmul.mubr.bf16.vlgmr.msra.gmra.mxu1 %v256_v45 }
  0xfb   :  { %672 = vmatpush3.bf16.msra.mxu1 %v933_v2  ;;  %485 = vmatprep.mubr.bf16.mxu1 %v452_v44 }
  0xfc   :  { %673 = vmatprep.subr.bf16.mxu1 %v938_v3  ;;  %v622_v3 = vld [vmem:[%s1166_s6] ss:$0 sm:$0xff]  ;;  %s851_s6 = scalar_lea.vmem %s585_s17, 256 }
  0xfd   :  { %p852_p5 = scmp.ne.s32.totalorder %s585_s17, %s851_s6  ;;  %p857_p7 = scmp.lt.s32.totalorder %s851_s6, %s851_s6 }
  0xff   :  { %674 = vmatpush3.bf16.msra.mxu1 %v944_v4  ;;  %p858_p8 = por %p857_p7, %p856_p6 }
 0x100   :  { %675 = vmatprep.subr.bf16.mxu1 %v950_v5 }
 0x101   :  { %p859_p9 = pnand %p858_p8, %p852_p5 }
 0x103   :  { %676 = vmatpush3.bf16.msra.mxu1 %v956_v6 }
 0x104   :  { %677 = vmatprep.subr.bf16.mxu1 %v962_v7 }
 0x107   :  { %678 = vmatpush3.bf16.msra.mxu1 %v968_v8 }
 0x108   :  { %679 = vmatprep.subr.bf16.mxu1 %v974_v9 }
 0x10b   :  { %680 = vmatpush3.bf16.msra.mxu1 %v980_v10 }
 0x10c   :  { %681 = vmatprep.subr.bf16.mxu1 %v986_v11 }
 0x10f   :  { %682 = vmatpush3.bf16.msra.mxu1 %v996_v15 }
 0x110   :  { %683 = vmatprep.subr.bf16.mxu1 %v1002_v16 }
 0x113   :  { %684 = vmatpush3.bf16.msra.mxu1 %v1011_v18 }
 0x114   :  { %685 = vmatprep.subr.bf16.mxu1 %v1017_v19 }
 0x117   :  { %686 = vmatpush3.bf16.msra.mxu1 %v1027_v21 }
 0x118   :  { %771 = vmatprep.subr.bf16.mxu1 %v878_v0 }
 0x11a   :  { %486 = vmatmul.mubr.bf16.vlgmr.msra.gmra.mxu1 %v451_v47 }
 0x11b   :  { %772 = vmatpush3.bf16.msra.mxu1 %v823_v29  ;;  %787 = vmatprep.mubr.msk.bf16.mxu1 %vm879_vm0, %v878_v0 }
 0x11c   :  { %773 = vmatprep.subr.bf16.mxu1 %v878_v0 }
 0x11f   :  { %774 = vmatpush3.bf16.msra.mxu1 %v824_v30 }
 0x120   :  { %775 = vmatprep.subr.bf16.mxu1 %v878_v0 }
 0x123   :  { %776 = vmatpush3.bf16.msra.mxu1 %v825_v31 }
 0x124   :  { %777 = vmatprep.subr.bf16.mxu1 %v878_v0 }
 0x127   :  { %778 = vmatpush3.bf16.msra.mxu1 %v826_v32 }
 0x128   :  { %779 = vmatprep.subr.bf16.mxu1 %v878_v0 }
 0x12b   :  { %780 = vmatpush3.bf16.msra.mxu1 %v827_v33 }
 0x12c   :  { %781 = vmatprep.subr.bf16.mxu1 %v878_v0 }
 0x12f   :  { %782 = vmatpush3.bf16.msra.mxu1 %v828_v34 }
 0x130   :  { %783 = vmatprep.subr.bf16.mxu1 %v878_v0 }
 0x133   :  { %784 = vmatpush3.bf16.msra.mxu1 %v829_v48 }
 0x134   :  { %785 = vmatprep.subr.bf16.mxu1 %v878_v0 }
 0x137   :  { %786 = vmatpush3.bf16.msra.mxu1 %v830_v49 }
 0x1ba   :  { %v345_v51 = vpop.f32.mrf.mxu1 }
 0x1bb   :  { %v346_v52 = vadd.f32 %v613_v50, %v345_v51 }
 0x1bc   :  { %v729_v53 = vpop.f32.mrf.mxu1 }
 0x1bd   :  { %v351_v54 = vmax.f32 %v346_v52, 0.0 }
 0x1be   :  { %v348_v55 = vpop.f32.mrf.mxu1 }
 0x1bf   :  { %v352_v56 = vpack.c.bf16 %v351_v54, %v351_v54 }
 0x1c0   :  { %v730_v57 = vpop.f32.mrf.mxu1 }
 0x1c1   :  { %748 = vmatmul.mubr.bf16.vlgmr.msra.gmra.mxu0 %v352_v56 }
 0x1c2   :  { %752 = vmatpush3.bf16.msra.mxu0 %v991_v14  ;;  %767 = vmatprep.mubr.msk.bf16.mxu0 %vm879_vm0, %v878_v0 }
 0x1c3   :  { %753 = vmatprep.subr.bf16.mxu0 %v878_v0 }
 0x1c6   :  { %754 = vmatpush3.bf16.msra.mxu0 %v1006_v17 }
 0x1c7   :  { %755 = vmatprep.subr.bf16.mxu0 %v878_v0 }
 0x1ca   :  { %756 = vmatpush3.bf16.msra.mxu0 %v1019_v20 }
 0x1cb   :  { %757 = vmatprep.subr.bf16.mxu0 %v878_v0 }
 0x1ce   :  { %758 = vmatpush3.bf16.msra.mxu0 %v1033_v23 }
 0x1cf   :  { %759 = vmatprep.subr.bf16.mxu0 %v878_v0 }
 0x1d2   :  { %760 = vmatpush3.bf16.msra.mxu0 %v1041_v25 }
 0x1d3   :  { %761 = vmatprep.subr.bf16.mxu0 %v878_v0 }
 0x1d6   :  { %762 = vmatpush3.bf16.msra.mxu0 %v1046_v26 }
 0x1d7   :  { %763 = vmatprep.subr.bf16.mxu0 %v878_v0 }
 0x1da   :  { %v687_v58 = vpop.f32.mrf.mxu1  ;;  %764 = vmatpush3.bf16.msra.mxu0 %v1051_v27 }
 0x1db   :  { %765 = vmatprep.subr.bf16.mxu0 %v878_v0 }
 0x1dc   :  { %v688_v59 = vpop.f32.mrf.mxu1 }
 0x1dd   :  { %v689_v60 = vadd.f32 %v688_v59, %v687_v58 }
 0x1de   :  { %v690_v61 = vpop.f32.mrf.mxu1  ;;  %766 = vmatpush3.bf16.msra.mxu0 %v1055_v28 }
 0x1df   :  { %v488_v62 = vadd.f32 %v689_v60, %v1089_v36 }
 0x1e0   :  { %v691_v63 = vpop.f32.mrf.mxu1 }
 0x1e1   :  { %v493_v1 = vmax.f32 %v488_v62, 0.0 }
 0x1e3   :  { %v494_v2 = vpack.c.bf16 %v493_v1, %v493_v1 }
 0x1e5   :  { %768 = vmatmul.mubr.bf16.vlgmr.msra.gmra.mxu0 %v494_v2 }
 0x281   :  { %v441_v4 = vpop.f32.mrf.mxu0 }
 0x282   :  { %v442_v5 = vadd.f32 %v622_v3, %v441_v4 }
 0x283   :  { %v749_v6 = vpop.f32.mrf.mxu0 }
 0x284   :  { %448 = vst.msk [vmem:[#allocation5] sm:$0xff] %vm447_vm1, %v442_v5 }
 0x285   :  { %v444_v0 = vpop.f32.mrf.mxu0 }
 0x287   :  { %v750_v7 = vpop.f32.mrf.mxu0 }
 0x2a5   :  { %v529_v8 = vpop.f32.mrf.mxu0 }
 0x2a6   :  { %v530_v9 = vadd.f32 %v613_v50, %v529_v8 }
 0x2a7   :  { %v769_v10 = vpop.f32.mrf.mxu0 }
 0x2a8   :  { %v535_v11 = vmax.f32 %v530_v9, 0.0 }
 0x2a9   :  { %v532_v12 = vpop.f32.mrf.mxu0 }
 0x2aa   :  { %v536_v13 = vpack.c.bf16 %v535_v11, %v535_v11 }
 0x2ab   :  { %v770_v14 = vpop.f32.mrf.mxu0 }
 0x2ac   :  { %788 = vmatmul.mubr.bf16.vlgmr.msra.gmra.mxu1 %v536_v13 }
 0x36c   :  { %v571_v15 = vpop.f32.mrf.mxu1 }
 0x36d   :  { %v572_v16 = vadd.f32 %v622_v3, %v571_v15 }
 0x36e   :  { %v789_v17 = vpop.f32.mrf.mxu1 }
 0x36f   :  { %578 = vst.msk [vmem:[#allocation5 + $0x8] sm:$0xff] %vm447_vm1, %v572_v16 }
 0x370   :  { %v574_v18 = vpop.f32.mrf.mxu1 }
 0x371   :  { %862 = shalt.err (!%p859_p9)
}
 0x372   :  { %s881_s18 = smov 128   ;;  %s882_s1 = smov 8   ;;  %v790_v19 = vpop.f32.mrf.mxu1 }
 0x373   :  { %590 = dma.vmem_to_hbm [thread:$0]  %s585_s17, 256, %s1167_s7, [#allocation4], %s881_s18, %s881_s18, %s882_s1  }
 0x374   :  { %873 = dma.done.wait [#allocation4], 256  }
 0x375   :  { %874 = vsyncadd [#allocation4], 4294967040 }
 0x376   :  { %594 = vsyncpa [#allocation3], 1 }
 0x377   :  { %595 = vsyncpa [#allocation4], 1 }

</bundles_post_ra>
